<compile_context>
chip_gen: v6e
topology: v6e:2x2x1
jax: 0.10.0
libtpu: 0.0.40
codegen_flags: <defaults>
</compile_context>

<pallas_src>
import jax
import jax.numpy as jnp
from jax import lax
from jax.experimental import pallas as pl
from jax.experimental.pallas import tpu as pltpu

BN_EPS = 1e-5


def siamese_fused_kernel(x1_ref, x2_ref, w1_ref, w2_ref, rows_ref, o_ref):
    """Both Siamese branches in one invocation (shared weights, per-branch BN stats)."""
    h2_dim = w1_ref.shape[1]   # 2H
    h_dim = w2_ref.shape[1]    # H

    x1 = x1_ref[...].astype(jnp.float32)          # (N, D)
    x2 = x2_ref[...].astype(jnp.float32)          # (N, D)
    inv_n = 1.0 / float(x1.shape[0])

    # ---- BatchNorm1d (train mode), per-branch stats, mean-centered (two-pass) var ----
    def bn_normalize(x):
        mean = jnp.sum(x, axis=0, keepdims=True) * inv_n
        xc = x - mean
        var = jnp.sum(xc * xc, axis=0, keepdims=True) * inv_n
        return xc * lax.rsqrt(var + BN_EPS)        # gamma/beta folded into w1/b1

    x_hat = jnp.concatenate([bn_normalize(x1), bn_normalize(x2)], axis=0)   # (2N, D)

    # ---- packed row buffer: [ b1 (2H) | b2 (H) | w3 (H) | b3 (1) ] ----
    rows = rows_ref[...]                                         # (1, 4H+1)
    b1 = rows[:, 0:h2_dim]                                       # (1, 2H)
    b2 = rows[:, h2_dim:h2_dim + h_dim]                          # (1, H)
    w3 = rows[:, h2_dim + h_dim:h2_dim + 2 * h_dim]              # (1, H)
    b3 = rows[:, h2_dim + 2 * h_dim:h2_dim + 2 * h_dim + 1]      # (1, 1)

    # ---- nn1 + ReLU, nn2 + ReLU (single M=2N matmul per layer for both branches) ----
    h1 = jnp.maximum(
        jnp.dot(x_hat, w1_ref[...], preferred_element_type=jnp.float32) + b1, 0.0)
    h2 = jnp.maximum(
        jnp.dot(h1, w2_ref[...], preferred_element_type=jnp.float32) + b2, 0.0)

    # ---- pred head: (1,H) x (2N,H)^T -> lane-dense (1, 2N) row (trans_b matmul) ----
    out_row = lax.dot_general(w3, h2, (((1,), (1,)), ((), ())),
                              preferred_element_type=jnp.float32)            # (1, 2N)
    o_ref[...] = (out_row + b3).astype(o_ref.dtype)


def fold_params(params):
    """One-time weight preprocessing (hoisted OUT of the per-forward path).

    Folds the BatchNorm affine (gamma/beta) into the first linear layer:
        w1' = gamma.T * w1,  b1' = beta @ w1 + b1
    and packs all small row tensors into a single lane-row buffer so the kernel
    needs only 5 input DMAs.
    """
    w1f = params["gamma"].reshape(-1, 1) * params["w1"]              # (D, 2H)
    b1f = params["beta"] @ params["w1"] + params["b1"]               # (1, 2H)
    rows = jnp.concatenate(
        [b1f, params["b2"], params["w3"].reshape(1, -1), params["b3"].reshape(1, 1)],
        axis=1)                                                      # (1, 2H+H+H+1)
    return {"w1": w1f, "w2": params["w2"], "rows": rows}


def siamese_forward(x1, x2, folded):
    """SiameseNet.forward: returns (lam(x1), lam(x2)) with shared weights."""
    assert x1.shape == x2.shape
    n, _ = x1.shape

    out_row = pl.pallas_call(
        siamese_fused_kernel,
        out_shape=jax.ShapeDtypeStruct((1, 2 * n), jnp.float32),
        # No grid: single invocation, all operands fully VMEM-resident,
        # single-buffered (no pipeline bookkeeping).
        in_specs=[pl.BlockSpec(memory_space=pltpu.MemorySpace.VMEM)] * 5,
        out_specs=pl.BlockSpec(memory_space=pltpu.MemorySpace.VMEM),
    )(x1, x2, folded["w1"], folded["w2"], folded["rows"])

    # Split the lane-dense (1, 2N) row back into the two (N, 1) branch outputs.
    return out_row[0, :n].reshape(n, 1), out_row[0, n:].reshape(n, 1)


def init_params(key, input_dim=10, hidden_dim=10, output_dim=1):
    """Deterministic synthetic parameters matching the shared lamNet's shapes."""
    k1, k2, k3, k4, k5, k6 = jax.random.split(key, 6)

    def linear(kw, kb, fan_in, fan_out):
        # Uniform(-1/sqrt(fan_in), 1/sqrt(fan_in)) like PyTorch's default init.
        bound = 1.0 / jnp.sqrt(jnp.float32(fan_in))
        w = jax.random.uniform(kw, (fan_in, fan_out), jnp.float32, -bound, bound)
        b = jax.random.uniform(kb, (1, fan_out), jnp.float32, -bound, bound)
        return w, b

    w1, b1 = linear(k1, k2, input_dim, 2 * hidden_dim)
    w2, b2 = linear(k3, k4, 2 * hidden_dim, hidden_dim)
    w3, b3 = linear(k5, k6, hidden_dim, output_dim)

    return {
        "gamma": jnp.ones((1, input_dim), jnp.float32),    # BatchNorm1d weight init
        "beta": jnp.zeros((1, input_dim), jnp.float32),    # BatchNorm1d bias init
        "w1": w1, "b1": b1,
        "w2": w2, "b2": b2,
        "w3": w3, "b3": b3,
    }


def lam_reference(x, p):
    """Pure-JAX reference of the shared branch (training-mode batchnorm, unfused)."""
    mean = jnp.mean(x, axis=0, keepdims=True)
    var = jnp.mean((x - mean) ** 2, axis=0, keepdims=True)
    h = (x - mean) / jnp.sqrt(var + BN_EPS) * p["gamma"] + p["beta"]
    h = jnp.maximum(h @ p["w1"] + p["b1"], 0.0)
    h = jnp.maximum(h @ p["w2"] + p["b2"], 0.0)
    return h @ p["w3"] + p["b3"]


# TODO(synk): predict_proba / evaluate are host-side numpy batching + argmax helpers
# (not part of forward); they are not translated to Pallas.

if __name__ == "__main__":
    key = jax.random.PRNGKey(0)
    kx1, kx2, kp = jax.random.split(key, 3)

    batch, input_dim, hidden_dim, output_dim = 8, 10, 10, 1
    x1 = jax.random.normal(kx1, (batch, input_dim), jnp.float32)
    x2 = jax.random.normal(kx2, (batch, input_dim), jnp.float32)
    params = init_params(kp, input_dim, hidden_dim, output_dim)

    folded = fold_params(params)            # hoisted: runs once, not on every forward
    fwd = jax.jit(siamese_forward)

    out1, out2 = fwd(x1, x2, folded)
    out1 = jax.block_until_ready(out1)
    out2 = jax.block_until_ready(out2)

    ref1 = lam_reference(x1, params)
    ref2 = lam_reference(x2, params)

    assert out1.shape == (batch, output_dim) and out2.shape == (batch, output_dim)
    assert jnp.allclose(out1, ref1, atol=1e-4, rtol=1e-4)
    assert jnp.allclose(out2, ref2, atol=1e-4, rtol=1e-4)

    print("KERNEL_OK")
</pallas_src>

<mosaic_0001>
module attributes {stable_mosaic.version = 11 : i64} {
  func.func @siamese_fused_kernel(%arg0: memref<8x10xf32, #tpu.memory_space<vmem>>, %arg1: memref<8x10xf32, #tpu.memory_space<vmem>>, %arg2: memref<10x20xf32, #tpu.memory_space<vmem>>, %arg3: memref<20x10xf32, #tpu.memory_space<vmem>>, %arg4: memref<1x41xf32, #tpu.memory_space<vmem>>, %arg5: memref<1x16xf32, #tpu.memory_space<vmem>>) attributes {dimension_semantics = [], scalar_prefetch = 0 : i64, scratch_operands = 0 : i64, tpu.core_type = #tpu.core_type<tc>} {
    %c0 = arith.constant 0 : index
    %c0_0 = arith.constant 0 : index
    %0 = vector.load %arg0[%c0, %c0_0] : memref<8x10xf32, #tpu.memory_space<vmem>>, vector<8x10xf32>
    %c0_1 = arith.constant 0 : index
    %c0_2 = arith.constant 0 : index
    %1 = vector.load %arg1[%c0_1, %c0_2] : memref<8x10xf32, #tpu.memory_space<vmem>>, vector<8x10xf32>
    %cst = arith.constant dense<0.000000e+00> : vector<10xf32>
    %2 = vector.multi_reduction <add>, %0, %cst [0] : vector<8x10xf32> to vector<10xf32>
    %3 = vector.shape_cast %2 : vector<10xf32> to vector<1x10xf32>
    %cst_3 = arith.constant 1.250000e-01 : f32
    %4 = vector.broadcast %cst_3 : f32 to vector<1x10xf32>
    %5 = arith.mulf %3, %4 : vector<1x10xf32>
    %6 = vector.broadcast %5 : vector<1x10xf32> to vector<8x10xf32>
    %7 = arith.subf %0, %6 : vector<8x10xf32>
    %8 = arith.mulf %7, %7 : vector<8x10xf32>
    %cst_4 = arith.constant dense<0.000000e+00> : vector<10xf32>
    %9 = vector.multi_reduction <add>, %8, %cst_4 [0] : vector<8x10xf32> to vector<10xf32>
    %10 = vector.shape_cast %9 : vector<10xf32> to vector<1x10xf32>
    %cst_5 = arith.constant 1.250000e-01 : f32
    %11 = vector.broadcast %cst_5 : f32 to vector<1x10xf32>
    %12 = arith.mulf %10, %11 : vector<1x10xf32>
    %cst_6 = arith.constant 9.99999974E-6 : f32
    %13 = vector.broadcast %cst_6 : f32 to vector<1x10xf32>
    %14 = arith.addf %12, %13 : vector<1x10xf32>
    %15 = math.rsqrt %14 : vector<1x10xf32>
    %16 = vector.broadcast %15 : vector<1x10xf32> to vector<8x10xf32>
    %17 = arith.mulf %7, %16 : vector<8x10xf32>
    %cst_7 = arith.constant dense<0.000000e+00> : vector<10xf32>
    %18 = vector.multi_reduction <add>, %1, %cst_7 [0] : vector<8x10xf32> to vector<10xf32>
    %19 = vector.shape_cast %18 : vector<10xf32> to vector<1x10xf32>
    %cst_8 = arith.constant 1.250000e-01 : f32
    %20 = vector.broadcast %cst_8 : f32 to vector<1x10xf32>
    %21 = arith.mulf %19, %20 : vector<1x10xf32>
    %22 = vector.broadcast %21 : vector<1x10xf32> to vector<8x10xf32>
    %23 = arith.subf %1, %22 : vector<8x10xf32>
    %24 = arith.mulf %23, %23 : vector<8x10xf32>
    %cst_9 = arith.constant dense<0.000000e+00> : vector<10xf32>
    %25 = vector.multi_reduction <add>, %24, %cst_9 [0] : vector<8x10xf32> to vector<10xf32>
    %26 = vector.shape_cast %25 : vector<10xf32> to vector<1x10xf32>
    %cst_10 = arith.constant 1.250000e-01 : f32
    %27 = vector.broadcast %cst_10 : f32 to vector<1x10xf32>
    %28 = arith.mulf %26, %27 : vector<1x10xf32>
    %cst_11 = arith.constant 9.99999974E-6 : f32
    %29 = vector.broadcast %cst_11 : f32 to vector<1x10xf32>
    %30 = arith.addf %28, %29 : vector<1x10xf32>
    %31 = math.rsqrt %30 : vector<1x10xf32>
    %32 = vector.broadcast %31 : vector<1x10xf32> to vector<8x10xf32>
    %33 = arith.mulf %23, %32 : vector<8x10xf32>
    %34 = tpu.concatenate %17, %33 in 0 : vector<8x10xf32>, vector<8x10xf32> -> vector<16x10xf32>
    %c0_12 = arith.constant 0 : index
    %c0_13 = arith.constant 0 : index
    %35 = vector.load %arg4[%c0_12, %c0_13] : memref<1x41xf32, #tpu.memory_space<vmem>>, vector<1x41xf32>
    %36 = vector.extract_strided_slice %35 {offsets = [0, 0], sizes = [1, 20], strides = [1, 1]} : vector<1x41xf32> to vector<1x20xf32>
    %37 = vector.extract_strided_slice %35 {offsets = [0, 20], sizes = [1, 10], strides = [1, 1]} : vector<1x41xf32> to vector<1x10xf32>
    %38 = vector.extract_strided_slice %35 {offsets = [0, 30], sizes = [1, 10], strides = [1, 1]} : vector<1x41xf32> to vector<1x10xf32>
    %39 = vector.extract_strided_slice %35 {offsets = [0, 40], sizes = [1, 1], strides = [1, 1]} : vector<1x41xf32> to vector<1x1xf32>
    %c0_14 = arith.constant 0 : index
    %c0_15 = arith.constant 0 : index
    %40 = vector.load %arg2[%c0_14, %c0_15] : memref<10x20xf32, #tpu.memory_space<vmem>>, vector<10x20xf32>
    %cst_16 = arith.constant dense<0.000000e+00> : vector<16x20xf32>
    %41 = tpu.matmul %34, %40, %cst_16 {dimension_numbers = #tpu.dot_dimension_numbers<[1], [0], [0], [1], [0, 0, 1, 1], [], []>} : vector<16x10xf32>, vector<10x20xf32>, vector<16x20xf32> -> vector<16x20xf32>
    %42 = vector.broadcast %36 : vector<1x20xf32> to vector<16x20xf32>
    %43 = arith.addf %41, %42 : vector<16x20xf32>
    %cst_17 = arith.constant 0.000000e+00 : f32
    %44 = vector.broadcast %cst_17 : f32 to vector<16x20xf32>
    %45 = arith.maximumf %43, %44 : vector<16x20xf32>
    %c0_18 = arith.constant 0 : index
    %c0_19 = arith.constant 0 : index
    %46 = vector.load %arg3[%c0_18, %c0_19] : memref<20x10xf32, #tpu.memory_space<vmem>>, vector<20x10xf32>
    %cst_20 = arith.constant dense<0.000000e+00> : vector<16x10xf32>
    %47 = tpu.matmul %45, %46, %cst_20 {dimension_numbers = #tpu.dot_dimension_numbers<[1], [0], [0], [1], [0, 0, 1, 1], [], []>} : vector<16x20xf32>, vector<20x10xf32>, vector<16x10xf32> -> vector<16x10xf32>
    %48 = vector.broadcast %37 : vector<1x10xf32> to vector<16x10xf32>
    %49 = arith.addf %47, %48 : vector<16x10xf32>
    %cst_21 = arith.constant 0.000000e+00 : f32
    %50 = vector.broadcast %cst_21 : f32 to vector<16x10xf32>
    %51 = arith.maximumf %49, %50 : vector<16x10xf32>
    %cst_22 = arith.constant dense<0.000000e+00> : vector<1x16xf32>
    %52 = tpu.matmul %38, %51, %cst_22 {dimension_numbers = #tpu.dot_dimension_numbers<[1], [1], [0], [0], [0, 0, 1, 0], [], []>} : vector<1x10xf32>, vector<16x10xf32>, vector<1x16xf32> -> vector<1x16xf32>
    %53 = vector.broadcast %39 : vector<1x1xf32> to vector<1x16xf32>
    %54 = arith.addf %52, %53 : vector<1x16xf32>
    %c0_23 = arith.constant 0 : index
    %c0_24 = arith.constant 0 : index
    %55 = vector.load %arg5[%c0_23, %c0_24] : memref<1x16xf32, #tpu.memory_space<vmem>>, vector<1x16xf32>
    tpu.vector_store %arg5[%c0_23, %c0_24], %54 {strides = array<i32>} : memref<1x16xf32, #tpu.memory_space<vmem>>, vector<1x16xf32>,
    return
  }
}

</mosaic_0001>

<bundles_post_ra>
// kernel: siamese_forward.1
= control target key start
LH: loop header
LB: loop body
LE: loop exit
PB: predicated region body
PF: predicated region fallthrough
CT: control target
= control target key end

     0   :  { %vm80_vm0 = vcmask 1041408   ;;  %vm22_vm1 = vcmask 80896   ;;  %v69_v46 = vlaneseq  ;;  %vm174_vm2 = vcmask 1043456   ;;  %s404_s6 = smov 108   ;;  %s405_s7 = smov 98   ;;  %s475_s2 = inlined_call_operand.vmem [shape: f32[10,20], index: 2, kind: input, shape index: {}]   ;;  %s476_s0 = inlined_call_operand.vmem [shape: f32[8,10], index: 0, kind: input, shape index: {}]   ;;  %s477_s1 = inlined_call_operand.vmem [shape: f32[8,10], index: 1, kind: input, shape index: {}]   ;;  %s478_s3 = inlined_call_operand.vmem [shape: f32[20,10], index: 3, kind: input, shape index: {}]   ;;  %s479_s4 = inlined_call_operand.vmem [shape: f32[1,41], index: 4, kind: input, shape index: {}]   ;;  %s480_s5 = inlined_call_operand.vmem [shape: f32[1,16], index: 5, kind: output, shape index: {}]  }
   0x1   :  { %v67_v0 = vld [vmem:[%s475_s2 + $0x8] sm:$0x3]  ;;  %v66_v1 = vld [vmem:[%s475_s2] sm:$0xff]  ;;  %v163_v48 = vld [vmem:[%s478_s3 + $0x10] sm:$0xf]  ;;  %vm167_vm3 = vcmask 162816  }
   0x2   :  { %v20_v2 = vld [vmem:[%s476_s0] sm:$0xff]  ;;  %370 = vmatprep.subr.msk.mxu1 %vm80_vm0, %v67_v0  ;;  %v70_v47 = vshrl.u32 %v69_v46, 7  ;;  %v162_v50 = vld [vmem:[%s478_s3 + $0x8] sm:$0xff]  ;;  %v406_v60 = vmov 0.0   ;;  %vm407_vm4 = vmmov 0   ;;  %v408_v61 = vmov 40  }
   0x3   :  { %v23_v3 = vsel %vm22_vm1, %v20_v2, 0.0  ;;  %v21_v4 = vld [vmem:[%s477_s1] sm:$0xff]  ;;  %371 = vmatpush3.msk.msra.mxu1 %vm80_vm0, %v67_v0  ;;  %386 = vmatprep.subr.mxu0 %v406_v60  ;;  %vm343_vm5 = vcmask 122880  }
   0x4   :  { %v24_v5 = vrot.slane %v23_v3, 4  ;;  %v44_v6 = vsel %vm22_vm1, %v21_v4, 0.0  ;;  %372 = vmatprep.subr.mxu1 %v66_v1  ;;  %v71_v49 = vsub.s32 0, %v70_v47  ;;  %v65_v51 = vld [vmem:[%s479_s4] sm:$0x1]  ;;  %390 = vmatprep.mubr.msk.f32.mxu0 %vm407_vm4, %v406_v60 }
   0x5   :  { %v45_v7 = vrot.slane %v44_v6, 4  ;;  %373 = vmatpush3.msra.mxu1 %v66_v1  ;;  %v161_v52 = vld [vmem:[%s478_s3] sm:$0xff]  ;;  %398 = vset.pattern.permute.xlu1 %v408_v61 }
   0x6   :  { %v25_v8 = vadd.f32 %v24_v5, %v23_v3  ;;  %377 = vmatprep.subr.msk.mxu1 %vm174_vm2, %v163_v48  ;;  %v72_v53 = vrot.slane %v65_v51, %v71_v49  ;;  %399 = vset.pattern.permute.xlu0 %v408_v61 }
   0x7   :  { %v46_v9 = vadd.f32 %v45_v7, %v44_v6  ;;  %256 = vperm.xlu1 %398, %v65_v51  }
   0x8   :  { %v26_v10 = vrot.slane %v25_v8, 2  ;;  %164 = vrot.lane.b32.xlu0 %v72_v53, %s404_s6 }
   0x9   :  { %v47_v11 = vrot.slane %v46_v9, 2 }
   0xa   :  { %v27_v12 = vadd.f32 %v26_v10, %v25_v8 }
   0xb   :  { %v48_v13 = vadd.f32 %v47_v11, %v46_v9 }
   0xc   :  { %v28_v14 = vrot.slane %v27_v12, 1  ;;  %263 = vrot.lane.b32.xlu0 %v72_v53, %s405_s7 }
   0xd   :  { %v49_v15 = vrot.slane %v48_v13, 1 }
   0xe   :  { %v29_v16 = vadd.f32 %v28_v14, %v27_v12 }
   0xf   :  { %v50_v17 = vadd.f32 %v49_v15, %v48_v13 }
  0x10   :  { %v30_v18 = vmul.f32 0.125, %v29_v16 }
  0x11   :  { %v51_v19 = vmul.f32 0.125, %v50_v17 }
  0x12   :  { %v31_v20 = vsub.f32 %v20_v2, %v30_v18 }
  0x13   :  { %v52_v21 = vsub.f32 %v21_v4, %v51_v19 }
  0x14   :  { %v32_v22 = vmul.f32 %v31_v20, %v31_v20 }
  0x15   :  { %v53_v23 = vmul.f32 %v52_v21, %v52_v21 }
  0x16   :  { %v33_v24 = vsel %vm22_vm1, %v32_v22, 0.0 }
  0x17   :  { %v34_v25 = vrot.slane %v33_v24, 4  ;;  %v54_v26 = vsel %vm22_vm1, %v53_v23, 0.0 }
  0x18   :  { %v55_v27 = vrot.slane %v54_v26, 4 }
  0x19   :  { %v35_v28 = vadd.f32 %v34_v25, %v33_v24 }
  0x1a   :  { %v56_v29 = vadd.f32 %v55_v27, %v54_v26 }
  0x1b   :  { %v36_v30 = vrot.slane %v35_v28, 2 }
  0x1c   :  { %v57_v31 = vrot.slane %v56_v29, 2 }
  0x1d   :  { %v37_v32 = vadd.f32 %v36_v30, %v35_v28 }
  0x1e   :  { %v58_v33 = vadd.f32 %v57_v31, %v56_v29 }
  0x1f   :  { %v38_v34 = vrot.slane %v37_v32, 1 }
  0x20   :  { %v59_v35 = vrot.slane %v58_v33, 1 }
  0x21   :  { %v39_v36 = vadd.f32 %v38_v34, %v37_v32 }
  0x22   :  { %v60_v37 = vadd.f32 %v59_v35, %v58_v33 }
  0x23   :  { %v40_v38 = vmul.f32 0.125, %v39_v36 }
  0x24   :  { %v61_v39 = vmul.f32 0.125, %v60_v37 }
  0x25   :  { %v41_v40 = vadd.f32 1e-05, %v40_v38 }
  0x26   :  { %v62_v41 = vadd.f32 1e-05, %v61_v39 }
  0x27   :  { %400 = vrsqrt.f32 %v41_v40 }
  0x28   :  { %402 = vrsqrt.f32 %v62_v41 }
  0x34   :  { %v401_v42 = vpop.eup %400 }
  0x35   :  { %v403_v43 = vpop.eup %402  ;;  %v43_v44 = vmul.f32 %v401_v42, %v31_v20 }
  0x36   :  { %v64_v45 = vmul.f32 %v403_v43, %v52_v21 }
  0x37   :  { %374 = vmatprep.mubr.msk.f32.mxu1 %vm22_vm1, %v43_v44 }
  0x38   :  { %375 = vmatmul.mubr.msk.f32.vlgmr.msra.gmra.mxu1 %vm22_vm1, %v64_v45 }
  0x39   :  { %378 = vmatpush3.msk.msra.mxu1 %vm174_vm2, %v163_v48 }
  0x3a   :  { %379 = vmatprep.subr.mxu1 %v162_v50 }
  0x3b   :  { %380 = vmatpush3.msra.mxu1 %v162_v50 }
  0x3c   :  { %381 = vmatprep.subr.mxu1 %v161_v52 }
  0x3d   :  { %382 = vmatpush3.msra.mxu1 %v161_v52 }
  0x7a   :  { %v165_v62 = vpop.permute.xlu0 %164 }
  0x7e   :  { %v264_v5 = vpop.permute.xlu0 %263 }
  0x82   :  { %v257_v6 = vpop.permute.xlu1 %256 }
  0x83   :  { %v262_v7 = vrot.slane %v257_v6, %v71_v49 }
  0xf8   :  { %v376_v54 = vpop.f32.mrf.mxu1 }
  0xf9   :  { %v156_v55 = vadd.f32 %v376_v54, %v72_v53 }
  0xfa   :  { %v150_v56 = vpop.f32.mrf.mxu1 }
  0xfb   :  { %v151_v57 = vadd.f32 %v150_v56, %v72_v53  ;;  %v160_v59 = vmax.f32 %v156_v55, 0.0 }
  0xfd   :  { %v159_v58 = vmax.f32 %v151_v57, 0.0 }
  0xff   :  { %383 = vmatprep.mubr.msk.f32.mxu1 %vm167_vm3, %v159_v58 }
 0x100   :  { %384 = vmatmul.mubr.msk.f32.vlgmr.msra.gmra.mxu1 %vm167_vm3, %v160_v59 }
 0x1c0   :  { %v385_v63 = vpop.f32.mrf.mxu1 }
 0x1c1   :  { %v250_v0 = vadd.f32 %v385_v63, %v165_v62 }
 0x1c2   :  { %v244_v1 = vpop.f32.mrf.mxu1 }
 0x1c3   :  { %v254_v2 = vmax.f32 %v250_v0, 0.0  ;;  %v245_v3 = vadd.f32 %v244_v1, %v165_v62 }
 0x1c5   :  { %387 = vmatpush3.xpose.msk.msra.mxu0 %vm22_vm1, %v254_v2  ;;  %v253_v4 = vmax.f32 %v245_v3, 0.0 }
 0x1c6   :  { %388 = vmatprep.subr.mxu0 %v406_v60 }
 0x1c9   :  { %389 = vmatpush3.xpose.msk.msra.mxu0 %vm22_vm1, %v253_v4 }
 0x1cc   :  { %391 = vmatmul.mubr.msk.f32.vlgmr.msra.gmra.mxu0 %vm22_vm1, %v264_v5 }
 0x28c   :  { %v339_v8 = vpop.f32.mrf.mxu0 }
 0x28d   :  { %v340_v9 = vadd.f32 %v339_v8, %v262_v7 }
 0x28e   :  { %v392_v10 = vpop.f32.mrf.mxu0 }
 0x28f   :  { %344 = vst.msk [vmem:[%s480_s5] sm:$0x1] %vm343_vm5, %v340_v9 }

</bundles_post_ra>
